<compile_context>
chip_gen: v7x
topology: tpu7x:2x2x1
jax: 0.10.0
libtpu: 0.0.40
codegen_flags: <defaults>
</compile_context>

<pallas_src>
import functools
import math

import jax
import jax.numpy as jnp
from jax.experimental import pallas as pl
from jax.experimental.pallas import tpu as pltpu

EPS = 1e-5
LANE = 128


def _round_up(n, m):
    return ((n + m - 1) // m) * m


def _full_spec(shape):
    nd = len(shape)
    return pl.BlockSpec(shape, lambda *args: (0,) * nd)


def _make_fused_kernel(num_hidden, batch_norm, hid_pad, out_pad):
    """Whole-network kernel; layer count is static -> fully unrolled."""
    n_layers = num_hidden + 1
    n_vec_rows = (2 * num_hidden + 1) if batch_norm else (num_hidden + 1)

    def kernel(*refs):
        x_ref = refs[0]
        w_refs = refs[1:1 + n_layers]          # bf16, pre-transposed [in, out]
        vec_ref = refs[1 + n_layers]           # stacked gammas/betas/bias (f32)
        o_ref = refs[-1]

        vec = vec_ref[...]                     # tiny, load once
        a = x_ref[...]                         # bf16 activations, live in vregs

        for i in range(num_hidden):
            # MXU: bf16 x bf16 operands, f32 accumulation, no transposes.
            y = jnp.dot(a, w_refs[i][...], preferred_element_type=jnp.float32)
            if batch_norm:
                gamma = vec[i:i + 1, :hid_pad]
                beta = vec[num_hidden + i:num_hidden + i + 1, :hid_pad]
                # Linear bias is cancelled by the mean subtraction -> skipped.
                mean = jnp.mean(y, axis=0, keepdims=True)
                d = y - mean                                   # reused below
                var = jnp.mean(d * d, axis=0, keepdims=True)   # stable two-pass
                scale = gamma * jax.lax.rsqrt(var + EPS)       # rsqrt -> EUP
                a = jnp.maximum(d * scale + beta, 0.0).astype(jnp.bfloat16)
            else:
                bias = vec[i:i + 1, :hid_pad]
                a = jnp.maximum(y + bias, 0.0).astype(jnp.bfloat16)
            # Dropout: identity (eval mode) -- see TODO above.

        y = jnp.dot(a, w_refs[-1][...], preferred_element_type=jnp.float32)
        o_ref[...] = y + vec[n_vec_rows - 1:n_vec_rows, :out_pad]

    return kernel


def init_params(key, input_size, output_size, fcs_hidden_size, fcs_num_hidden_layers):
    """Matches FullyConnectedNet._initialize_weights: kaiming_normal_ (fan_in,
       gain=sqrt(2)) weights, zero biases; BatchNorm1d gamma=1, beta=0.
       Weights kept PyTorch-style [out, in], f32."""
    dims = [(input_size, fcs_hidden_size)]
    dims += [(fcs_hidden_size, fcs_hidden_size)] * (fcs_num_hidden_layers - 1)
    dims += [(fcs_hidden_size, output_size)]

    layers = []
    for fan_in, fan_out in dims:
        key, sub = jax.random.split(key)
        std = math.sqrt(2.0 / fan_in)
        w = std * jax.random.normal(sub, (fan_out, fan_in), dtype=jnp.float32)
        b = jnp.zeros((fan_out,), dtype=jnp.float32)
        layers.append((w, b))

    bn = [(jnp.ones((fcs_hidden_size,), jnp.float32),
           jnp.zeros((fcs_hidden_size,), jnp.float32))
          for _ in range(fcs_num_hidden_layers)]
    return layers, bn


def prepare_params(layers, bn_params, batch_norm=True):
    """Host-side, one-time packing:
       * weights -> bf16, transposed [in, out], out dims lane-padded to 128;
         the FIRST layer keeps the true input K (x is passed unpadded).
       * all per-layer vectors stacked into one f32 [rows, max_pad] block.
       Zero padding is exact: padded output columns stay 0 through Linear/BN/
       ReLU and padded K rows of the next weight are 0."""
    num_hidden = len(layers) - 1
    hid = layers[0][0].shape[0]
    out_f = layers[-1][0].shape[0]
    hid_pad = _round_up(hid, LANE)
    out_pad = _round_up(out_f, LANE)
    vec_w = max(hid_pad, out_pad)

    packed_w = []
    for li, (w, b) in enumerate(layers):
        o, i = w.shape
        in_dim = i if li == 0 else hid_pad
        out_dim = hid_pad if li < num_hidden else out_pad
        wt = jnp.zeros((in_dim, out_dim), jnp.float32).at[:i, :o].set(w.T)
        packed_w.append(wt.astype(jnp.bfloat16))

    rows = []
    if batch_norm:
        for gamma, _ in bn_params:
            rows.append(jnp.zeros((vec_w,), jnp.float32).at[:gamma.shape[0]].set(gamma))
        for _, beta in bn_params:
            rows.append(jnp.zeros((vec_w,), jnp.float32).at[:beta.shape[0]].set(beta))
        rows.append(jnp.zeros((vec_w,), jnp.float32).at[:out_f].set(layers[-1][1]))
    else:
        for _, b in layers:
            rows.append(jnp.zeros((vec_w,), jnp.float32).at[:b.shape[0]].set(b))
    vec = jnp.stack(rows, axis=0)
    return packed_w, vec


@functools.partial(jax.jit, static_argnames=("output_size", "batch_norm"))
def fully_connected_net_forward(x, packed_w, vec, output_size, batch_norm=True):
    n, in_f = x.shape
    hid_pad = packed_w[0].shape[1]
    out_pad = packed_w[-1].shape[1]
    num_hidden = len(packed_w) - 1

    x_b = x.astype(jnp.bfloat16)                 # activations carried in bf16
    operands = [x_b] + list(packed_w) + [vec]

    # VMEM budget: operand blocks (x2 for pipeline buffers) + f32 working set.
    op_bytes = sum(int(o.size) * o.dtype.itemsize for o in operands)
    out_bytes = n * out_pad * 4
    act_bytes = 6 * n * max(in_f, hid_pad, out_pad) * 4
    needed = 2 * op_bytes + 2 * out_bytes + act_bytes
    try:
        phys = int(getattr(pltpu.get_tpu_info(), "vmem_capacity_bytes", 64 << 20))
    except Exception:  # pragma: no cover - conservative fallback
        phys = 64 << 20
    vmem_limit = int(min(max(needed, 32 << 20), int(phys * 0.9)))

    kernel = _make_fused_kernel(num_hidden, batch_norm, hid_pad, out_pad)

    if batch_norm:
        # BatchNorm needs full-batch statistics -> whole batch resident for a
        # single grid point.
        # TODO(synk): for very large batches a stats-then-apply two-pass grid
        #             would restore batch tiling / dual-TC use on v7x.
        out = pl.pallas_call(
            kernel,
            out_shape=jax.ShapeDtypeStruct((n, out_pad), jnp.float32),
            in_specs=[_full_spec(op.shape) for op in operands],
            out_specs=_full_spec((n, out_pad)),
            compiler_params=pltpu.CompilerParams(vmem_limit_bytes=vmem_limit),
        )(*operands)
    else:
        # Per-row independent -> tile the batch, pipeline DMA, parallel axis
        # shards across v7x's two TensorCores.
        tn = n if n <= 512 else 256
        grid = (pl.cdiv(n, tn),)
        in_specs = [pl.BlockSpec((tn, in_f), lambda i: (i, 0))]
        in_specs += [_full_spec(w.shape) for w in packed_w]
        in_specs += [_full_spec(vec.shape)]
        out = pl.pallas_call(
            kernel,
            out_shape=jax.ShapeDtypeStruct((n, out_pad), jnp.float32),
            grid=grid,
            in_specs=in_specs,
            out_specs=pl.BlockSpec((tn, out_pad), lambda i: (i, 0)),
            compiler_params=pltpu.CompilerParams(
                dimension_semantics=("parallel",),
                vmem_limit_bytes=vmem_limit),
        )(*operands)
    return out[:, :output_size]


def reference_forward(x, layers, bn_params, batch_norm):
    """Pure-JAX f32 reference matching the PyTorch forward (eval-mode dropout)."""
    a = x
    num_hidden = len(layers) - 1
    for i in range(num_hidden):
        w, b = layers[i]
        y = a @ w.T + b
        if batch_norm:
            gamma, beta = bn_params[i]
            mean = jnp.mean(y, axis=0, keepdims=True)
            var = jnp.mean((y - mean) ** 2, axis=0, keepdims=True)
            y = (y - mean) / jnp.sqrt(var + EPS) * gamma + beta
        a = jnp.maximum(y, 0.0)
    w, b = layers[-1]
    return a @ w.T + b


if __name__ == "__main__":
    # FullyConnectedNet(input_size=16, output_size=8, fcs_dropout=0.5,
    #                   batch_norm=..., fcs_hidden_size=32, fcs_num_hidden_layers=2)
    input_size, output_size = 16, 8
    hidden, num_hidden = 32, 2
    batch = 8

    key = jax.random.PRNGKey(0)
    key, kx = jax.random.split(key)
    x = jax.random.normal(kx, (batch, input_size), dtype=jnp.float32)

    layers, bn_params = init_params(key, input_size, output_size, hidden, num_hidden)

    for batch_norm in (True, False):
        packed_w, vec = prepare_params(layers, bn_params, batch_norm=batch_norm)
        out = fully_connected_net_forward(x, packed_w, vec,
                                          output_size=output_size,
                                          batch_norm=batch_norm)
        out = jax.block_until_ready(out)
        assert out.shape == (batch, output_size)
        assert bool(jnp.all(jnp.isfinite(out)))
        ref = reference_forward(x, layers, bn_params, batch_norm)
        max_err = float(jnp.max(jnp.abs(out - ref)))
        assert max_err < 1e-1, f"max abs err vs reference too large: {max_err}"

    print("KERNEL_OK")
</pallas_src>

<mosaic_0001>
module attributes {stable_mosaic.version = 11 : i64} {
  func.func @kernel(%arg0: memref<8x16xbf16, #tpu.memory_space<vmem>>, %arg1: memref<16x128xbf16, #tpu.memory_space<vmem>>, %arg2: memref<128x128xbf16, #tpu.memory_space<vmem>>, %arg3: memref<128x128xbf16, #tpu.memory_space<vmem>>, %arg4: memref<5x128xf32, #tpu.memory_space<vmem>>, %arg5: memref<8x128xf32, #tpu.memory_space<vmem>>) attributes {dimension_semantics = [], scalar_prefetch = 0 : i64, scratch_operands = 0 : i64, tpu.core_type = #tpu.core_type<tc>} {
    %c0 = arith.constant 0 : index
    %c0_0 = arith.constant 0 : index
    %0 = vector.load %arg4[%c0, %c0_0] : memref<5x128xf32, #tpu.memory_space<vmem>>, vector<5x128xf32>
    %c0_1 = arith.constant 0 : index
    %c0_2 = arith.constant 0 : index
    %1 = vector.load %arg0[%c0_1, %c0_2] : memref<8x16xbf16, #tpu.memory_space<vmem>>, vector<8x16xbf16>
    %c0_3 = arith.constant 0 : index
    %c0_4 = arith.constant 0 : index
    %2 = vector.load %arg1[%c0_3, %c0_4] : memref<16x128xbf16, #tpu.memory_space<vmem>>, vector<16x128xbf16>
    %cst = arith.constant dense<0.000000e+00> : vector<8x128xf32>
    %3 = tpu.matmul %1, %2, %cst {dimension_numbers = #tpu.dot_dimension_numbers<[1], [0], [0], [1], [0, 0, 1, 1], [], []>} : vector<8x16xbf16>, vector<16x128xbf16>, vector<8x128xf32> -> vector<8x128xf32>
    %4 = vector.extract_strided_slice %0 {offsets = [0, 0], sizes = [1, 128], strides = [1, 1]} : vector<5x128xf32> to vector<1x128xf32>
    %5 = vector.extract_strided_slice %0 {offsets = [2, 0], sizes = [1, 128], strides = [1, 1]} : vector<5x128xf32> to vector<1x128xf32>
    %cst_5 = arith.constant dense<0.000000e+00> : vector<128xf32>
    %6 = vector.multi_reduction <add>, %3, %cst_5 [0] : vector<8x128xf32> to vector<128xf32>
    %7 = vector.shape_cast %6 : vector<128xf32> to vector<1x128xf32>
    %cst_6 = arith.constant 8.000000e+00 : f32
    %8 = vector.broadcast %cst_6 : f32 to vector<1x128xf32>
    %9 = arith.divf %7, %8 : vector<1x128xf32>
    %10 = vector.broadcast %9 : vector<1x128xf32> to vector<8x128xf32>
    %11 = arith.subf %3, %10 : vector<8x128xf32>
    %12 = arith.mulf %11, %11 : vector<8x128xf32>
    %cst_7 = arith.constant dense<0.000000e+00> : vector<128xf32>
    %13 = vector.multi_reduction <add>, %12, %cst_7 [0] : vector<8x128xf32> to vector<128xf32>
    %14 = vector.shape_cast %13 : vector<128xf32> to vector<1x128xf32>
    %cst_8 = arith.constant 8.000000e+00 : f32
    %15 = vector.broadcast %cst_8 : f32 to vector<1x128xf32>
    %16 = arith.divf %14, %15 : vector<1x128xf32>
    %cst_9 = arith.constant 9.99999974E-6 : f32
    %17 = vector.broadcast %cst_9 : f32 to vector<1x128xf32>
    %18 = arith.addf %16, %17 : vector<1x128xf32>
    %19 = math.rsqrt %18 : vector<1x128xf32>
    %20 = arith.mulf %4, %19 : vector<1x128xf32>
    %21 = vector.broadcast %20 : vector<1x128xf32> to vector<8x128xf32>
    %22 = arith.mulf %11, %21 : vector<8x128xf32>
    %23 = vector.broadcast %5 : vector<1x128xf32> to vector<8x128xf32>
    %24 = arith.addf %22, %23 : vector<8x128xf32>
    %cst_10 = arith.constant 0.000000e+00 : f32
    %25 = vector.broadcast %cst_10 : f32 to vector<8x128xf32>
    %26 = arith.maximumf %24, %25 : vector<8x128xf32>
    %27 = arith.truncf %26 : vector<8x128xf32> to vector<8x128xbf16>
    %c0_11 = arith.constant 0 : index
    %c0_12 = arith.constant 0 : index
    %28 = vector.load %arg2[%c0_11, %c0_12] : memref<128x128xbf16, #tpu.memory_space<vmem>>, vector<128x128xbf16>
    %cst_13 = arith.constant dense<0.000000e+00> : vector<8x128xf32>
    %29 = tpu.matmul %27, %28, %cst_13 {dimension_numbers = #tpu.dot_dimension_numbers<[1], [0], [0], [1], [0, 0, 1, 1], [], []>} : vector<8x128xbf16>, vector<128x128xbf16>, vector<8x128xf32> -> vector<8x128xf32>
    %30 = vector.extract_strided_slice %0 {offsets = [1, 0], sizes = [1, 128], strides = [1, 1]} : vector<5x128xf32> to vector<1x128xf32>
    %31 = vector.extract_strided_slice %0 {offsets = [3, 0], sizes = [1, 128], strides = [1, 1]} : vector<5x128xf32> to vector<1x128xf32>
    %cst_14 = arith.constant dense<0.000000e+00> : vector<128xf32>
    %32 = vector.multi_reduction <add>, %29, %cst_14 [0] : vector<8x128xf32> to vector<128xf32>
    %33 = vector.shape_cast %32 : vector<128xf32> to vector<1x128xf32>
    %cst_15 = arith.constant 8.000000e+00 : f32
    %34 = vector.broadcast %cst_15 : f32 to vector<1x128xf32>
    %35 = arith.divf %33, %34 : vector<1x128xf32>
    %36 = vector.broadcast %35 : vector<1x128xf32> to vector<8x128xf32>
    %37 = arith.subf %29, %36 : vector<8x128xf32>
    %38 = arith.mulf %37, %37 : vector<8x128xf32>
    %cst_16 = arith.constant dense<0.000000e+00> : vector<128xf32>
    %39 = vector.multi_reduction <add>, %38, %cst_16 [0] : vector<8x128xf32> to vector<128xf32>
    %40 = vector.shape_cast %39 : vector<128xf32> to vector<1x128xf32>
    %cst_17 = arith.constant 8.000000e+00 : f32
    %41 = vector.broadcast %cst_17 : f32 to vector<1x128xf32>
    %42 = arith.divf %40, %41 : vector<1x128xf32>
    %cst_18 = arith.constant 9.99999974E-6 : f32
    %43 = vector.broadcast %cst_18 : f32 to vector<1x128xf32>
    %44 = arith.addf %42, %43 : vector<1x128xf32>
    %45 = math.rsqrt %44 : vector<1x128xf32>
    %46 = arith.mulf %30, %45 : vector<1x128xf32>
    %47 = vector.broadcast %46 : vector<1x128xf32> to vector<8x128xf32>
    %48 = arith.mulf %37, %47 : vector<8x128xf32>
    %49 = vector.broadcast %31 : vector<1x128xf32> to vector<8x128xf32>
    %50 = arith.addf %48, %49 : vector<8x128xf32>
    %cst_19 = arith.constant 0.000000e+00 : f32
    %51 = vector.broadcast %cst_19 : f32 to vector<8x128xf32>
    %52 = arith.maximumf %50, %51 : vector<8x128xf32>
    %53 = arith.truncf %52 : vector<8x128xf32> to vector<8x128xbf16>
    %c0_20 = arith.constant 0 : index
    %c0_21 = arith.constant 0 : index
    %54 = vector.load %arg3[%c0_20, %c0_21] : memref<128x128xbf16, #tpu.memory_space<vmem>>, vector<128x128xbf16>
    %cst_22 = arith.constant dense<0.000000e+00> : vector<8x128xf32>
    %55 = tpu.matmul %53, %54, %cst_22 {dimension_numbers = #tpu.dot_dimension_numbers<[1], [0], [0], [1], [0, 0, 1, 1], [], []>} : vector<8x128xbf16>, vector<128x128xbf16>, vector<8x128xf32> -> vector<8x128xf32>
    %56 = vector.extract_strided_slice %0 {offsets = [4, 0], sizes = [1, 128], strides = [1, 1]} : vector<5x128xf32> to vector<1x128xf32>
    %57 = vector.broadcast %56 : vector<1x128xf32> to vector<8x128xf32>
    %58 = arith.addf %55, %57 : vector<8x128xf32>
    %c0_23 = arith.constant 0 : index
    %c0_24 = arith.constant 0 : index
    %59 = vector.load %arg5[%c0_23, %c0_24] : memref<8x128xf32, #tpu.memory_space<vmem>>, vector<8x128xf32>
    tpu.vector_store %arg5[%c0_23, %c0_24], %58 {strides = array<i32>} : memref<8x128xf32, #tpu.memory_space<vmem>>, vector<8x128xf32>,
    return
  }
}

</mosaic_0001>

<bundles_post_ra>
// kernel: fully_connected_net_forward.1
= control target key start
LH: loop header
LB: loop body
LE: loop exit
PB: predicated region body
PF: predicated region fallthrough
CT: control target
= control target key end

     0   :  { %10 = vsyncpa [#allocation3], 0  ;;  %s696_s0 = inlined_call_operand.vmem [shape: bf16[8,16], index: 0, kind: input, shape index: {}]   ;;  %s697_s1 = inlined_call_operand.vmem [shape: bf16[16,128], index: 1, kind: input, shape index: {}]   ;;  %s698_s2 = inlined_call_operand.hbm [shape: bf16[128,128], index: 2, kind: input, shape index: {}]   ;;  %s699_s3 = inlined_call_operand.hbm [shape: bf16[128,128], index: 3, kind: input, shape index: {}]   ;;  %s700_s4 = inlined_call_operand.vmem [shape: f32[5,128], index: 4, kind: input, shape index: {}]   ;;  %s701_s5 = inlined_call_operand.hbm [shape: f32[8,128], index: 5, kind: output, shape index: {}]  }
   0x1   :  { %11 = vsyncpa [#allocation6], 0 }
   0x2   :  { %12 = vsyncpa [#allocation4], 0  ;;  %s580_s18 = smov [#allocation2]   ;;  %s508_s22 = scalar_lea.hbm %s698_s2, 1024 }
   0x3   :  { %s22_s19 = sshll.u32 %s580_s18, 4  ;;  %p509_p0 = scmp.ne.s32.totalorder %s698_s2, %s508_s22  ;;  %s23_s19 = int_to_ptr.vmem [resolvable:$true] %s22_s19 }
   0x4   :  { %p512_p1 = scmp.lt.u32.totalorder %s508_s22, %s698_s2 }
   0x6   :  { %p514_p2 = pnand %p512_p1, %p509_p0 }
   0x8   :  { %517 = shalt.err (!%p514_p2)
}
   0x9   :  { %s518_s27 = scalar_lea.vmem %s23_s19, 1024  ;;  %p523_p4 = scmp.lt.s32.totalorder %s23_s19, %s23_s19 }
   0xa   :  { %p519_p3 = scmp.ne.s32.totalorder %s23_s19, %s518_s27  ;;  %p524_p5 = scmp.lt.s32.totalorder %s518_s27, %s518_s27 }
   0xc   :  { %p525_p6 = por %p524_p5, %p523_p4 }
   0xe   :  { %p526_p7 = pnand %p525_p6, %p519_p3 }
  0x10   :  { %529 = shalt.err (!%p526_p7)
}
  0x11   :  { %s581_s28 = smov 64   ;;  %s582_s29 = smov 4  }
  0x12   :  { %28 = dma.hbm_to_vmem [thread:$0]  %s698_s2, 1024, %s23_s19, [#allocation3], %s581_s28, %s581_s28, %s582_s29  }
  0x13   :  { %s583_s7 = smov [#allocation5]   ;;  %s530_s11 = scalar_lea.hbm %s699_s3, 1024 }
  0x14   :  { %s34_s8 = sshll.u32 %s583_s7, 4  ;;  %p531_p8 = scmp.ne.s32.totalorder %s699_s3, %s530_s11  ;;  %s35_s8 = int_to_ptr.vmem [resolvable:$true] %s34_s8 }
  0x15   :  { %p534_p9 = scmp.lt.u32.totalorder %s530_s11, %s699_s3 }
  0x17   :  { %p536_p10 = pnand %p534_p9, %p531_p8 }
  0x19   :  { %539 = shalt.err (!%p536_p10)
}
  0x1a   :  { %s540_s16 = scalar_lea.vmem %s35_s8, 1024  ;;  %p545_p12 = scmp.lt.s32.totalorder %s35_s8, %s35_s8 }
  0x1b   :  { %p541_p11 = scmp.ne.s32.totalorder %s35_s8, %s540_s16  ;;  %p546_p13 = scmp.lt.s32.totalorder %s540_s16, %s540_s16 }
  0x1d   :  { %p547_p0 = por %p546_p13, %p545_p12 }
  0x1f   :  { %p548_p1 = pnand %p547_p0, %p541_p11 }
  0x21   :  { %551 = shalt.err (!%p548_p1)
}
  0x22   :  { %40 = dma.hbm_to_vmem [thread:$0]  %s699_s3, 1024, %s35_s8, [#allocation6], %s581_s28, %s581_s28, %s582_s29  }
  0x23   :  { %574 = dma.done.wait [#allocation3], 1024  }
  0x24   :  { %575 = vsyncadd [#allocation3], 4294966272 }
  0x25   :  { %576 = dma.done.wait [#allocation6], 1024  }
  0x26   :  { %577 = vsyncadd [#allocation6], 4294966272  ;;  %v584_v0 = vmov 0.0   ;;  %vm585_vm0 = vmmov 0   ;;  %v487_v1 = vld [vmem:[%s697_s1] sm:$0xff]   ;;  %vm60_vm1 = vcmask 130048   ;;  %v124_v32 = vlaneseq }
  0x27   :  { %434 = vmatprep.subr.bf16.mxu0 %v584_v0  ;;  %436 = vmatprep.mubr.msk.bf16.mxu0 %vm585_vm0, %v584_v0  ;;  %v51_v2 = vld [vmem:[%s696_s0] sm:$0xf]  ;;  %v488_v3 = vld [vmem:[#allocation2] sm:$0xff]   ;;  %v490_v5 = vld [vmem:[#allocation2 + $0x10] sm:$0xff]  }
  0x28   :  { %440 = vmatprep.subr.bf16.mxu1 %v584_v0  ;;  %456 = vmatprep.mubr.msk.bf16.mxu1 %vm585_vm0, %v584_v0  ;;  %v489_v4 = vld [vmem:[#allocation2 + $0x8] sm:$0xff]   ;;  %v491_v6 = vld [vmem:[#allocation2 + $0x18] sm:$0xff]   ;;  %v492_v7 = vld [vmem:[#allocation2 + $0x20] sm:$0xff]   ;;  %v660_v33 = vshrl.u32 %v124_v32, 7 }
  0x29   :  { %435 = vmatpush3.bf16.msra.mxu0 %v487_v1  ;;  %441 = vmatpush3.bf16.msra.mxu1 %v488_v3  ;;  %v493_v8 = vld [vmem:[#allocation2 + $0x28] sm:$0xff]   ;;  %v494_v9 = vld [vmem:[#allocation2 + $0x30] sm:$0xff]   ;;  %v495_v10 = vld [vmem:[#allocation2 + $0x38] sm:$0xff]  }
  0x2a   :  { %460 = vmatprep.subr.bf16.mxu0 %v584_v0  ;;  %442 = vmatprep.subr.bf16.mxu1 %v584_v0  ;;  %v665_v34 = vld [vmem:[%s700_s4] sm:$0x1f]  ;;  %v126_v35 = vsub.s32 0, %v660_v33  ;;  %v131_v36 = vsub.s32 2, %v660_v33  ;;  %v496_v45 = vld [vmem:[#allocation5] sm:$0xff]   ;;  %v498_v47 = vld [vmem:[#allocation5 + $0x10] sm:$0xff]  }
  0x2b   :  { %v497_v46 = vld [vmem:[#allocation5 + $0x8] sm:$0xff]   ;;  %v499_v48 = vld [vmem:[#allocation5 + $0x18] sm:$0xff]   ;;  %v500_v49 = vld [vmem:[#allocation5 + $0x20] sm:$0xff]   ;;  %s586_s4 = smov [#allocation7]  }
  0x2c   :  { %437 = vmatmul.mubr.msk.bf16.vlgmr.msra.gmra.mrb[0].mxu0 %vm60_vm1, %v51_v2  ;;  %v132_v40 = vrot.slane %v665_v34, %v131_v36  ;;  %v501_v50 = vld [vmem:[#allocation5 + $0x28] sm:$0xff]   ;;  %v502_v51 = vld [vmem:[#allocation5 + $0x30] sm:$0xff]   ;;  %v503_v52 = vld [vmem:[#allocation5 + $0x38] sm:$0xff]   ;;  %s386_s21 = sshll.u32 %s586_s4, 4  ;;  %s387_s21 = int_to_ptr.vmem [resolvable:$true] %s386_s21 }
  0x2d   :  { %476 = vmatprep.mubr.msk.bf16.mxu0 %vm585_vm0, %v584_v0  ;;  %443 = vmatpush3.bf16.msra.mxu1 %v489_v4  ;;  %s552_s22 = scalar_lea.vmem %s387_s21, 128  ;;  %p557_p3 = scmp.lt.s32.totalorder %s387_s21, %s387_s21 }
  0x2e   :  { %444 = vmatprep.subr.bf16.mxu1 %v584_v0  ;;  %461 = vmatpush3.bf16.msra.mxu0 %v496_v45  ;;  %p553_p2 = scmp.ne.s32.totalorder %s387_s21, %s552_s22  ;;  %p558_p4 = scmp.lt.s32.totalorder %s552_s22, %s552_s22 }
  0x2f   :  { %462 = vmatprep.subr.bf16.mxu0 %v584_v0 }
  0x30   :  { %p559_p5 = por %p558_p4, %p557_p3 }
  0x31   :  { %445 = vmatpush3.bf16.msra.mxu1 %v490_v5 }
  0x32   :  { %446 = vmatprep.subr.bf16.mxu1 %v584_v0  ;;  %463 = vmatpush3.bf16.msra.mxu0 %v497_v46  ;;  %p560_p6 = pnand %p559_p5, %p553_p2 }
  0x33   :  { %464 = vmatprep.subr.bf16.mxu0 %v584_v0 }
  0x35   :  { %447 = vmatpush3.bf16.msra.mxu1 %v491_v6 }
  0x36   :  { %448 = vmatprep.subr.bf16.mxu1 %v584_v0  ;;  %465 = vmatpush3.bf16.msra.mxu0 %v498_v47 }
  0x37   :  { %466 = vmatprep.subr.bf16.mxu0 %v584_v0 }
  0x39   :  { %449 = vmatpush3.bf16.msra.mxu1 %v492_v7 }
  0x3a   :  { %450 = vmatprep.subr.bf16.mxu1 %v584_v0  ;;  %467 = vmatpush3.bf16.msra.mxu0 %v499_v48 }
  0x3b   :  { %468 = vmatprep.subr.bf16.mxu0 %v584_v0 }
  0x3d   :  { %451 = vmatpush3.bf16.msra.mxu1 %v493_v8 }
  0x3e   :  { %452 = vmatprep.subr.bf16.mxu1 %v584_v0  ;;  %469 = vmatpush3.bf16.msra.mxu0 %v500_v49 }
  0x3f   :  { %470 = vmatprep.subr.bf16.mxu0 %v584_v0 }
  0x41   :  { %453 = vmatpush3.bf16.msra.mxu1 %v494_v9 }
  0x42   :  { %454 = vmatprep.subr.bf16.mxu1 %v584_v0  ;;  %471 = vmatpush3.bf16.msra.mxu0 %v501_v50 }
  0x43   :  { %472 = vmatprep.subr.bf16.mxu0 %v584_v0 }
  0x45   :  { %455 = vmatpush3.bf16.msra.mxu1 %v495_v10  ;;  %v261_v10 = vsub.s32 1, %v660_v33 }
  0x46   :  { %473 = vmatpush3.bf16.msra.mxu0 %v502_v51 }
  0x47   :  { %474 = vmatprep.subr.bf16.mxu0 %v584_v0 }
  0x4a   :  { %475 = vmatpush3.bf16.msra.mxu0 %v503_v52 }
  0xff   :  { %v98_v11 = vpop.f32.mrb[0].mxu0 }
 0x100   :  { %v104_v12 = vrot.slane %v98_v11, 4  ;;  %v438_v13 = vpop.f32.mrb[1].mxu0 }
 0x101   :  { %v101_v14 = vpop.f32.mrb[2].mxu0 }
 0x102   :  { %v105_v15 = vadd.f32 %v104_v12, %v98_v11  ;;  %v439_v16 = vpop.f32.mrb[3].mxu0 }
 0x104   :  { %v106_v17 = vrot.slane %v105_v15, 2 }
 0x106   :  { %v107_v18 = vadd.f32 %v106_v17, %v105_v15 }
 0x108   :  { %v108_v19 = vrot.slane %v107_v18, 1 }
 0x10a   :  { %v109_v20 = vadd.f32 %v108_v19, %v107_v18 }
 0x10c   :  { %v111_v21 = vmul.f32 0.125, %v109_v20  ;;  %v289_v20 = vsub.s32 4, %v660_v33 }
 0x10e   :  { %v112_v22 = vsub.f32 %v98_v11, %v111_v21  ;;  %v266_v11 = vsub.s32 3, %v660_v33  ;;  %v290_v21 = vrot.slane %v665_v34, %v289_v20 }
 0x110   :  { %v113_v23 = vmul.f32 %v112_v22, %v112_v22  ;;  %v267_v15 = vrot.slane %v665_v34, %v266_v11 }
 0x112   :  { %v114_v24 = vrot.slane %v113_v23, 4 }
 0x114   :  { %v115_v25 = vadd.f32 %v114_v24, %v113_v23 }
 0x116   :  { %v116_v26 = vrot.slane %v115_v25, 2 }
 0x118   :  { %v117_v27 = vadd.f32 %v116_v26, %v115_v25 }
 0x11a   :  { %v118_v28 = vrot.slane %v117_v27, 1 }
 0x11c   :  { %v119_v29 = vadd.f32 %v118_v28, %v117_v27 }
 0x11e   :  { %v120_v30 = vmul.f32 0.125, %v119_v29 }
 0x120   :  { %v121_v31 = vadd.f32 1e-05, %v120_v30 }
 0x122   :  { %504 = vrsqrt.f32 %v121_v31 }
 0x12c   :  { %v505_v37 = vpop.eup %504 }
 0x12d   :  { %v123_v38 = vmul.f32 %v505_v37, %v665_v34 }
 0x12f   :  { %v127_v39 = vrot.slane %v123_v38, %v126_v35 }
 0x131   :  { %v128_v41 = vmul.f32 %v127_v39, %v112_v22 }
 0x133   :  { %v133_v42 = vadd.f32 %v132_v40, %v128_v41 }
 0x135   :  { %v134_v43 = vmax.f32 %v133_v42, 0.0 }
 0x137   :  { %v135_v44 = vpack.c.bf16 %v134_v43, %v134_v43 }
 0x139   :  { %457 = vmatmul.mubr.bf16.vlgmr.msra.gmra.mrb[0].mxu1 %v135_v44 }
 0x20c   :  { %v234_v53 = vpop.f32.mrb[0].mxu1 }
 0x20d   :  { %v240_v54 = vrot.slane %v234_v53, 4  ;;  %v458_v55 = vpop.f32.mrb[1].mxu1 }
 0x20e   :  { %v237_v56 = vpop.f32.mrb[2].mxu1 }
 0x20f   :  { %v241_v57 = vadd.f32 %v240_v54, %v234_v53  ;;  %v459_v58 = vpop.f32.mrb[3].mxu1 }
 0x211   :  { %v242_v59 = vrot.slane %v241_v57, 2 }
 0x213   :  { %v243_v60 = vadd.f32 %v242_v59, %v241_v57 }
 0x215   :  { %v244_v61 = vrot.slane %v243_v60, 1 }
 0x217   :  { %v245_v62 = vadd.f32 %v244_v61, %v243_v60 }
 0x219   :  { %v246_v63 = vmul.f32 0.125, %v245_v62 }
 0x21b   :  { %v247_v1 = vsub.f32 %v234_v53, %v246_v63 }
 0x21d   :  { %v248_v2 = vmul.f32 %v247_v1, %v247_v1 }
 0x21f   :  { %v249_v3 = vrot.slane %v248_v2, 4 }
 0x221   :  { %v250_v4 = vadd.f32 %v249_v3, %v248_v2 }
 0x223   :  { %v251_v5 = vrot.slane %v250_v4, 2 }
 0x225   :  { %v252_v6 = vadd.f32 %v251_v5, %v250_v4 }
 0x227   :  { %v253_v0 = vrot.slane %v252_v6, 1 }
 0x229   :  { %v254_v7 = vadd.f32 %v253_v0, %v252_v6 }
 0x22b   :  { %v255_v8 = vmul.f32 0.125, %v254_v7 }
 0x22d   :  { %v256_v9 = vadd.f32 1e-05, %v255_v8 }
 0x22f   :  { %506 = vrsqrt.f32 %v256_v9 }
 0x239   :  { %v507_v12 = vpop.eup %506 }
 0x23a   :  { %v258_v13 = vmul.f32 %v507_v12, %v665_v34 }
 0x23c   :  { %v262_v14 = vrot.slane %v258_v13, %v261_v10 }
 0x23e   :  { %v263_v16 = vmul.f32 %v262_v14, %v247_v1 }
 0x240   :  { %v268_v17 = vadd.f32 %v267_v15, %v263_v16 }
 0x242   :  { %v269_v18 = vmax.f32 %v268_v17, 0.0 }
 0x244   :  { %v270_v19 = vpack.c.bf16 %v269_v18, %v269_v18 }
 0x246   :  { %477 = vmatmul.mubr.bf16.vlgmr.msra.gmra.mrb[4].mxu0 %v270_v19 }
 0x319   :  { %v373_v22 = vpop.f32.mrb[4].mxu0 }
 0x31a   :  { %v374_v23 = vadd.f32 %v373_v22, %v290_v21  ;;  %v478_v24 = vpop.f32.mrb[5].mxu0 }
 0x31b   :  { %v376_v25 = vpop.f32.mrb[6].mxu0 }
 0x31c   :  { %379 = vst [vmem:[#allocation7] sm:$0xff] %v374_v23  ;;  %v479_v26 = vpop.f32.mrb[7].mxu0 }
 0x31d   :  { %563 = shalt.err (!%p560_p6)
}
 0x31e   :  { %s564_s25 = scalar_lea.hbm %s701_s5, 128 }
 0x31f   :  { %p565_p7 = scmp.ne.s32.totalorder %s701_s5, %s564_s25  ;;  %p568_p8 = scmp.lt.u32.totalorder %s564_s25, %s701_s5 }
 0x321   :  { %p570_p9 = pnand %p568_p8, %p565_p7 }
 0x323   :  { %573 = shalt.err (!%p570_p9)
}
 0x324   :  { %389 = dma.vmem_to_hbm [thread:$0]  %s387_s21, 128, %s701_s5, [#allocation4]  }
 0x325   :  { %578 = dma.done.wait [#allocation4], 128  }
 0x326   :  { %579 = vsyncadd [#allocation4], 4294967168 }
 0x327   :  { %393 = vsyncpa [#allocation3], 1 }
 0x328   :  { %394 = vsyncpa [#allocation6], 1 }
 0x329   :  { %395 = vsyncpa [#allocation4], 1 }

</bundles_post_ra>
